<compile_context>
chip_gen: v6e
topology: v6e:2x2x1
jax: 0.10.0
libtpu: 0.0.40
codegen_flags: <defaults>
</compile_context>

<pallas_src>
import math

import jax
import jax.numpy as jnp
from jax.experimental import pallas as pl
from jax.experimental.pallas import tpu as pltpu


# ----------------------------------------------------------------------------
# Fused GCN kernel:  out_tile = adj_tile @ (x @ W.T)
# ----------------------------------------------------------------------------
def _gcn_fused_kernel(x_ref, w_ref, adj_ref, o_ref):
    # support = x @ W.T : contract the shared F_in axis directly (no transpose).
    support = jax.lax.dot_general(
        x_ref[...], w_ref[...],
        dimension_numbers=(((1,), (1,)), ((), ())),
        preferred_element_type=jnp.float32,
    )
    # out_tile = adj_tile @ support, f32 accumulation on the MXU.
    o_ref[...] = jnp.dot(
        adj_ref[...], support.astype(adj_ref.dtype),
        preferred_element_type=jnp.float32,
    ).astype(o_ref.dtype)


def _round_up(v: int, m: int) -> int:
    return ((v + m - 1) // m) * m


def gcn_layer(x, adj, W, *, compute_dtype=None):
    """One GraphConvolution layer: adj @ (x @ W.T), fused in one pallas_call.

    x   : (N, F_in)      node features
    adj : (N, N)         dense row-normalized adjacency (torch.sparse.mm values)
    W   : (F_out, F_in)  nn.Linear weight layout
    compute_dtype : optionally cast MXU inputs (e.g. jnp.bfloat16); accumulation
                    stays f32 and the returned array is f32.
    """
    N, F_in = x.shape
    F_out, F_in_w = W.shape
    assert F_in_w == F_in and adj.shape == (N, N)

    # Lane-dense output: pad F_out to a multiple of 128 with zero rows of W so
    # both the on-chip `support` and the stored output tile are 128-lane dense.
    F_pad = _round_up(F_out, 128)
    if F_pad == F_out:
        W_k = W
    else:
        W_k = jnp.zeros((F_pad, F_in), W.dtype).at[:F_out, :].set(W)

    x_k, adj_k = x, adj
    if compute_dtype is not None:
        x_k = x_k.astype(compute_dtype)
        adj_k = adj_k.astype(compute_dtype)
        W_k = W_k.astype(compute_dtype)

    # Row tile over adj: full-height MXU tiles; use >= 2 blocks when the graph
    # is big enough so the `parallel` axis can feed both v7x TensorCores.  At
    # this toy size the grid collapses to (1,): one fused, VMEM-resident launch.
    tm = N
    for cand in (256, 128):
        if N % cand == 0 and N // cand >= 2:
            tm = cand
            break
    # Note: for graphs with N in the many-thousands, add a K grid axis over the
    # adj columns with a VMEM f32 accumulator (init/finalize via pl.when) and
    # cap tm for v7x's 64 MiB VMEM; unnecessary at this problem size.

    out = pl.pallas_call(
        _gcn_fused_kernel,
        out_shape=jax.ShapeDtypeStruct((N, F_pad), jnp.float32),
        grid=(N // tm,),
        in_specs=[
            pl.BlockSpec((N, F_in), lambda i: (0, 0)),       # x (full, resident)
            pl.BlockSpec((F_pad, F_in), lambda i: (0, 0)),   # W (full, resident)
            pl.BlockSpec((tm, N), lambda i: (i, 0)),         # adj row tile
        ],
        out_specs=pl.BlockSpec((tm, F_pad), lambda i: (i, 0)),
        compiler_params=pltpu.CompilerParams(
            dimension_semantics=("parallel",),
        ),
    )(x_k, W_k, adj_k)

    return out if F_pad == F_out else out[:, :F_out]


# ----------------------------------------------------------------------------
# LRGCPND forward (faithful port of the PyTorch module)
# ----------------------------------------------------------------------------
def lrgcpnd_forward(E_weight, adj, conv_weights, n, d_i, d_j, *, n_num, reg,
                    compute_dtype=None):
    """Returns (pre_i, pre_j, loss) like LRGCPND.forward."""
    embedding = E_weight
    x = embedding
    gcn_embedding = embedding
    l2_reg = jnp.zeros((), jnp.float32)
    for W in conv_weights:
        x = gcn_layer(x, adj, W, compute_dtype=compute_dtype)   # Pallas GCN
        gcn_embedding = jnp.concatenate((gcn_embedding, x), axis=-1)
        l2_reg = l2_reg + jnp.sqrt(jnp.sum(jnp.square(W)))      # torch.norm(W, 2)

    # TODO(synk): the embedding gathers and the BPR loss tail are negligible
    # vs. the GCN matmuls, so they stay in plain JAX rather than a Pallas kernel.
    n_e = jnp.take(gcn_embedding, n, axis=0)
    di_e = jnp.take(gcn_embedding, n_num + d_i, axis=0)
    dj_e = jnp.take(gcn_embedding, n_num + d_j, axis=0)
    pre_i = jnp.sum(n_e * di_e, axis=-1)
    pre_j = jnp.sum(n_e * dj_e, axis=-1)
    l2_reg = l2_reg + jnp.mean(jnp.sum(n_e ** 2 + di_e ** 2 + dj_e ** 2, axis=-1))
    loss = -jnp.mean(jnp.log(jax.nn.sigmoid(pre_i - pre_j))) + reg * l2_reg
    return pre_i, pre_j, loss


def lrgcpnd_reference(E_weight, adj, conv_weights, n, d_i, d_j, *, n_num, reg):
    """Pure-JAX reference (no Pallas) for correctness checking."""
    x = E_weight
    gcn_embedding = E_weight
    l2_reg = jnp.zeros((), jnp.float32)
    for W in conv_weights:
        x = adj @ (x @ W.T)
        gcn_embedding = jnp.concatenate((gcn_embedding, x), axis=-1)
        l2_reg = l2_reg + jnp.sqrt(jnp.sum(jnp.square(W)))
    n_e = jnp.take(gcn_embedding, n, axis=0)
    di_e = jnp.take(gcn_embedding, n_num + d_i, axis=0)
    dj_e = jnp.take(gcn_embedding, n_num + d_j, axis=0)
    pre_i = jnp.sum(n_e * di_e, axis=-1)
    pre_j = jnp.sum(n_e * dj_e, axis=-1)
    l2_reg = l2_reg + jnp.mean(jnp.sum(n_e ** 2 + di_e ** 2 + dj_e ** 2, axis=-1))
    loss = -jnp.mean(jnp.log(jax.nn.sigmoid(pre_i - pre_j))) + reg * l2_reg
    return pre_i, pre_j, loss


if __name__ == "__main__":
    # Small shapes consistent with the module: 96 "n" nodes + 32 "d" nodes,
    # embedding size 128 (naturally lane-dense), K=2 GCN layers, batch of 8.
    N_NUM, D_NUM = 96, 32
    N_NODES = N_NUM + D_NUM          # 128
    E_SIZE = 128
    K = 2
    REG = 1e-4
    BATCH = 8

    key = jax.random.PRNGKey(0)
    k_e, k_adj, k_w, k_n, k_i, k_j = jax.random.split(key, 6)

    # Parameters matching the PyTorch init:
    #   nn.init.normal_(E.weight, std=0.01)
    #   nn.init.normal_(conv.W.weight, std=1/sqrt(in_features)), shape (out, in)
    E_weight = 0.01 * jax.random.normal(k_e, (N_NODES, E_SIZE), dtype=jnp.float32)
    stdv = 1.0 / math.sqrt(E_SIZE)
    conv_weights = [
        stdv * jax.random.normal(wk, (E_SIZE, E_SIZE), dtype=jnp.float32)
        for wk in jax.random.split(k_w, K)
    ]

    # Sparse-ish row-normalized adjacency, stored dense (torch.sparse.mm values
    # are identical to the dense matmul).
    mask = (jax.random.uniform(k_adj, (N_NODES, N_NODES)) < 0.1).astype(jnp.float32)
    adj = mask / jnp.maximum(mask.sum(axis=1, keepdims=True), 1.0)

    n_idx = jax.random.randint(k_n, (BATCH,), 0, N_NUM)
    di_idx = jax.random.randint(k_i, (BATCH,), 0, D_NUM)
    dj_idx = jax.random.randint(k_j, (BATCH,), 0, D_NUM)

    # --- Pallas-backed forward (f32 MXU path) --------------------------------
    pre_i, pre_j, loss = lrgcpnd_forward(
        E_weight, adj, conv_weights, n_idx, di_idx, dj_idx,
        n_num=N_NUM, reg=REG)
    pre_i, pre_j, loss = jax.block_until_ready((pre_i, pre_j, loss))

    # --- reference check in plain JAX ----------------------------------------
    ref_i, ref_j, ref_loss = lrgcpnd_reference(
        E_weight, adj, conv_weights, n_idx, di_idx, dj_idx,
        n_num=N_NUM, reg=REG)
    assert pre_i.shape == (BATCH,) and pre_j.shape == (BATCH,)
    assert jnp.allclose(pre_i, ref_i, atol=2e-5, rtol=2e-3)
    assert jnp.allclose(pre_j, ref_j, atol=2e-5, rtol=2e-3)
    assert jnp.allclose(loss, ref_loss, atol=1e-4, rtol=1e-4)

    # --- bf16-MXU-input path of the fused GCN kernel (v6e/v7x optimization) --
    y_f32 = gcn_layer(E_weight, adj, conv_weights[0])
    y_bf16 = gcn_layer(E_weight, adj, conv_weights[0], compute_dtype=jnp.bfloat16)
    jax.block_until_ready(y_bf16)
    assert jnp.allclose(y_bf16, y_f32, atol=1e-3)

    # --- lane-padding path (F_out not a multiple of 128) ----------------------
    W_small = conv_weights[0][:32, :]                     # (32, 128) weight
    y_small = gcn_layer(E_weight, adj, W_small)
    jax.block_until_ready(y_small)
    ref_small = adj @ (E_weight @ W_small.T)
    assert y_small.shape == (N_NODES, 32)
    assert jnp.allclose(y_small, ref_small, atol=2e-5, rtol=2e-3)

    print("KERNEL_OK")
</pallas_src>

<mosaic_0001>
module attributes {stable_mosaic.version = 11 : i64} {
  func.func @_gcn_fused_kernel(%arg0: i32, %arg1: memref<128x128xf32, #tpu.memory_space<vmem>>, %arg2: memref<128x128xf32, #tpu.memory_space<vmem>>, %arg3: memref<128x128xf32, #tpu.memory_space<vmem>>, %arg4: memref<128x128xf32, #tpu.memory_space<vmem>>) attributes {dimension_semantics = [#tpu.dimension_semantics<parallel>], iteration_bounds = array<i64: 1>, scalar_prefetch = 0 : i64, scratch_operands = 0 : i64, tpu.core_type = #tpu.core_type<tc>, window_params = [{pipeline_mode = #tpu.pipeline_mode<synchronous>, transform_indices = @transform_0, window_bounds = array<i64: 128, 128>}, {pipeline_mode = #tpu.pipeline_mode<synchronous>, transform_indices = @transform_1, window_bounds = array<i64: 128, 128>}, {transform_indices = @transform_2, window_bounds = array<i64: 128, 128>}, {transform_indices = @transform_3, window_bounds = array<i64: 128, 128>}]} {
    %c0 = arith.constant 0 : index
    %c0_0 = arith.constant 0 : index
    %0 = vector.load %arg1[%c0, %c0_0] : memref<128x128xf32, #tpu.memory_space<vmem>>, vector<128x128xf32>
    %c0_1 = arith.constant 0 : index
    %c0_2 = arith.constant 0 : index
    %1 = vector.load %arg2[%c0_1, %c0_2] : memref<128x128xf32, #tpu.memory_space<vmem>>, vector<128x128xf32>
    %cst = arith.constant dense<0.000000e+00> : vector<128x128xf32>
    %2 = tpu.matmul %0, %1, %cst {dimension_numbers = #tpu.dot_dimension_numbers<[1], [1], [0], [0], [0, 0, 1, 0], [], []>} : vector<128x128xf32>, vector<128x128xf32>, vector<128x128xf32> -> vector<128x128xf32>
    %c0_3 = arith.constant 0 : index
    %c0_4 = arith.constant 0 : index
    %3 = vector.load %arg3[%c0_3, %c0_4] : memref<128x128xf32, #tpu.memory_space<vmem>>, vector<128x128xf32>
    %cst_5 = arith.constant dense<0.000000e+00> : vector<128x128xf32>
    %4 = tpu.matmul %3, %2, %cst_5 {dimension_numbers = #tpu.dot_dimension_numbers<[1], [0], [0], [1], [0, 0, 1, 1], [], []>} : vector<128x128xf32>, vector<128x128xf32>, vector<128x128xf32> -> vector<128x128xf32>
    %c0_6 = arith.constant 0 : index
    %c0_7 = arith.constant 0 : index
    %5 = vector.load %arg4[%c0_6, %c0_7] : memref<128x128xf32, #tpu.memory_space<vmem>>, vector<128x128xf32>
    tpu.vector_store %arg4[%c0_6, %c0_7], %4 {strides = array<i32>} : memref<128x128xf32, #tpu.memory_space<vmem>>, vector<128x128xf32>,
    return
  }
  func.func @transform_0(%arg0: i32) -> (i32, i32) {
    %c0_i32 = arith.constant 0 : i32
    %c0_i32_0 = arith.constant 0 : i32
    %c0_i32_1 = arith.constant 0 : i32
    return %c0_i32, %c0_i32_0 : i32, i32
  }
  func.func @transform_1(%arg0: i32) -> (i32, i32) {
    %c0_i32 = arith.constant 0 : i32
    %c0_i32_0 = arith.constant 0 : i32
    %c0_i32_1 = arith.constant 0 : i32
    return %c0_i32, %c0_i32_0 : i32, i32
  }
  func.func @transform_2(%arg0: i32) -> (i32, i32) {
    %c0_i32 = arith.constant 0 : i32
    %c0_i32_0 = arith.constant 0 : i32
    return %arg0, %c0_i32 : i32, i32
  }
  func.func @transform_3(%arg0: i32) -> (i32, i32) {
    %c0_i32 = arith.constant 0 : i32
    %c0_i32_0 = arith.constant 0 : i32
    return %arg0, %c0_i32 : i32, i32
  }
}

</mosaic_0001>

<bundles_post_ra>
// kernel: tpu_custom_call.1
= control target key start
LH: loop header
LB: loop body
LE: loop exit
PB: predicated region body
PF: predicated region fallthrough
CT: control target
= control target key end

     0   :  { %8 = vsyncpa [#allocation3], 0  ;;  %s746_s0 = inlined_call_operand.hbm [shape: f32[128,128], index: 0, kind: input, shape index: {}]   ;;  %s747_s1 = inlined_call_operand.hbm [shape: f32[128,128], index: 1, kind: input, shape index: {}]   ;;  %s748_s2 = inlined_call_operand.hbm [shape: f32[128,128], index: 2, kind: input, shape index: {}]   ;;  %s749_s3 = inlined_call_operand.hbm [shape: f32[128,128], index: 3, kind: output, shape index: {}]  }
   0x1   :  { %9 = vsyncpa [#allocation6], 0 }
   0x2   :  { %10 = vsyncpa [#allocation4], 0  ;;  %s696_s12 = smov [#allocation5]   ;;  %s697_s14 = smov [#allocation2]  }
   0x3   :  { %s28_s13 = sshll.u32 %s696_s12, 4  ;;  %s16_s15 = sshll.u32 %s697_s14, 4  ;;  %s29_s13 = int_to_ptr.vmem [resolvable:$true] %s28_s13  ;;  %s17_s15 = int_to_ptr.vmem [resolvable:$true] %s16_s15 }
   0x4   :  { %s618_s16 = scalar_lea.vmem %s29_s13, 2048  ;;  %p623_p1 = scmp.lt.s32.totalorder %s29_s13, %s29_s13 }
   0x5   :  { %p619_p0 = scmp.ne.s32.totalorder %s29_s13, %s618_s16  ;;  %p624_p2 = scmp.lt.s32.totalorder %s618_s16, %s618_s16 }
   0x7   :  { %p625_p3 = por %p624_p2, %p623_p1 }
   0x9   :  { %p626_p4 = pnand %p625_p3, %p619_p0 }
   0xb   :  { %629 = shalt.err (!%p626_p4)
}
   0xc   :  { %s698_s17 = smov 128   ;;  %s699_s18 = smov 8  }
   0xd   :  { %34 = dma.hbm_to_vmem [thread:$0]  %s747_s1, 2048, %s29_s13, [#allocation6], %s698_s17, %s698_s17, %s699_s18  }
   0xe   :  { %s638_s21 = scalar_lea.vmem %s17_s15, 2048  ;;  %p643_p6 = scmp.lt.s32.totalorder %s17_s15, %s17_s15 }
   0xf   :  { %p639_p5 = scmp.ne.s32.totalorder %s17_s15, %s638_s21  ;;  %p644_p7 = scmp.lt.s32.totalorder %s638_s21, %s638_s21 }
  0x11   :  { %p645_p8 = por %p644_p7, %p643_p6 }
  0x13   :  { %p646_p9 = pnand %p645_p8, %p639_p5 }
  0x15   :  { %649 = shalt.err (!%p646_p9)
}
  0x16   :  { %22 = dma.hbm_to_vmem [thread:$0]  %s746_s0, 2048, %s17_s15, [#allocation3], %s698_s17, %s698_s17, %s699_s18  }
  0x17   :  { %s700_s24 = smov [#allocation7]  }
  0x18   :  { %s40_s25 = sshll.u32 %s700_s24, 4  ;;  %s41_s25 = int_to_ptr.vmem [resolvable:$true] %s40_s25 }
  0x19   :  { %s658_s26 = scalar_lea.vmem %s41_s25, 2048  ;;  %p663_p11 = scmp.lt.s32.totalorder %s41_s25, %s41_s25 }
  0x1a   :  { %p659_p10 = scmp.ne.s32.totalorder %s41_s25, %s658_s26  ;;  %p664_p12 = scmp.lt.s32.totalorder %s658_s26, %s658_s26 }
  0x1c   :  { %p665_p13 = por %p664_p12, %p663_p11 }
  0x1e   :  { %p666_p0 = pnand %p665_p13, %p659_p10 }
  0x20   :  { %669 = shalt.err (!%p666_p0)
}
  0x21   :  { %46 = dma.hbm_to_vmem [thread:$0]  %s748_s2, 2048, %s41_s25, [#allocation6], %s698_s17, %s698_s17, %s699_s18  }
  0x22   :  { %690 = dma.done.wait [#allocation3], 2048  }
  0x23   :  { %691 = vsyncadd [#allocation3], 4294965248 }
  0x24   :  { %692 = dma.done.wait [#allocation6], 4096  }
  0x25   :  { %693 = vsyncadd [#allocation6], 4294963200  ;;  %v87_v0 = vld [vmem:[#allocation5 + $0x78] sm:$0xff]  ;;  %v86_v1 = vld [vmem:[#allocation5 + $0x70] sm:$0xff]  ;;  %s701_s0 = smov [#allocation8]  }
  0x26   :  { %492 = vmatprep.subr.mxu0 %v87_v0  ;;  %v85_v2 = vld [vmem:[#allocation5 + $0x68] sm:$0xff]  ;;  %v56_v3 = vld [vmem:[#allocation2] sm:$0xff]  ;;  %v83_v5 = vld [vmem:[#allocation5 + $0x58] sm:$0xff]  ;;  %s415_s2 = sshll.u32 %s701_s0, 4  ;;  %s416_s2 = int_to_ptr.vmem [resolvable:$true] %s415_s2 }
  0x27   :  { %493 = vmatpush3.xpose.msra.mxu0 %v87_v0  ;;  %524 = vmatprep.mubr.f32.mxu0 %v56_v3  ;;  %v84_v4 = vld [vmem:[#allocation5 + $0x60] sm:$0xff]  ;;  %v82_v6 = vld [vmem:[#allocation5 + $0x50] sm:$0xff]  ;;  %v81_v7 = vld [vmem:[#allocation5 + $0x48] sm:$0xff]  ;;  %s670_s28 = scalar_lea.vmem %s416_s2, 2048  ;;  %p675_p2 = scmp.lt.s32.totalorder %s416_s2, %s416_s2 }
  0x28   :  { %494 = vmatprep.subr.mxu0 %v86_v1  ;;  %v80_v8 = vld [vmem:[#allocation5 + $0x40] sm:$0xff]  ;;  %v79_v9 = vld [vmem:[#allocation5 + $0x38] sm:$0xff]  ;;  %v78_v10 = vld [vmem:[#allocation5 + $0x30] sm:$0xff]  ;;  %p671_p1 = scmp.ne.s32.totalorder %s416_s2, %s670_s28  ;;  %p676_p3 = scmp.lt.s32.totalorder %s670_s28, %s670_s28 }
  0x29   :  { %v77_v11 = vld [vmem:[#allocation5 + $0x28] sm:$0xff]  ;;  %v76_v12 = vld [vmem:[#allocation5 + $0x20] sm:$0xff]  ;;  %v75_v13 = vld [vmem:[#allocation5 + $0x18] sm:$0xff] }
  0x2a   :  { %v74_v14 = vld [vmem:[#allocation5 + $0x10] sm:$0xff]  ;;  %v73_v15 = vld [vmem:[#allocation5 + $0x8] sm:$0xff]  ;;  %v72_v16 = vld [vmem:[#allocation5] sm:$0xff]  ;;  %p677_p4 = por %p676_p3, %p675_p2 }
  0x2b   :  { %495 = vmatpush3.xpose.msra.mxu0 %v86_v1  ;;  %v57_v17 = vld [vmem:[#allocation2 + $0x8] sm:$0xff]  ;;  %v58_v18 = vld [vmem:[#allocation2 + $0x10] sm:$0xff]  ;;  %v59_v19 = vld [vmem:[#allocation2 + $0x18] sm:$0xff] }
  0x2c   :  { %496 = vmatprep.subr.mxu0 %v85_v2  ;;  %v60_v20 = vld [vmem:[#allocation2 + $0x20] sm:$0xff]  ;;  %v61_v21 = vld [vmem:[#allocation2 + $0x28] sm:$0xff]  ;;  %v62_v22 = vld [vmem:[#allocation2 + $0x30] sm:$0xff]  ;;  %p678_p5 = pnand %p677_p4, %p671_p1 }
  0x2d   :  { %v63_v23 = vld [vmem:[#allocation2 + $0x38] sm:$0xff]  ;;  %v64_v24 = vld [vmem:[#allocation2 + $0x40] sm:$0xff]  ;;  %v65_v25 = vld [vmem:[#allocation2 + $0x48] sm:$0xff] }
  0x2e   :  { %v66_v26 = vld [vmem:[#allocation2 + $0x50] sm:$0xff]  ;;  %v67_v27 = vld [vmem:[#allocation2 + $0x58] sm:$0xff]  ;;  %v68_v28 = vld [vmem:[#allocation2 + $0x60] sm:$0xff] }
  0x2f   :  { %497 = vmatpush3.xpose.msra.mxu0 %v85_v2  ;;  %v69_v29 = vld [vmem:[#allocation2 + $0x68] sm:$0xff]  ;;  %v70_v30 = vld [vmem:[#allocation2 + $0x70] sm:$0xff]  ;;  %v71_v31 = vld [vmem:[#allocation2 + $0x78] sm:$0xff] }
  0x30   :  { %498 = vmatprep.subr.mxu0 %v84_v4  ;;  %v233_v32 = vld [vmem:[#allocation7] sm:$0xff]  ;;  %v234_v49 = vld [vmem:[#allocation7 + $0x8] sm:$0xff]  ;;  %v235_v50 = vld [vmem:[#allocation7 + $0x10] sm:$0xff] }
  0x31   :  { %580 = vmatprep.mubr.f32.mxu1 %v233_v32  ;;  %v236_v51 = vld [vmem:[#allocation7 + $0x18] sm:$0xff]  ;;  %v237_v52 = vld [vmem:[#allocation7 + $0x20] sm:$0xff]  ;;  %v238_v53 = vld [vmem:[#allocation7 + $0x28] sm:$0xff] }
  0x32   :  { %v239_v54 = vld [vmem:[#allocation7 + $0x30] sm:$0xff]  ;;  %v240_v55 = vld [vmem:[#allocation7 + $0x38] sm:$0xff]  ;;  %v241_v56 = vld [vmem:[#allocation7 + $0x40] sm:$0xff] }
  0x33   :  { %499 = vmatpush3.xpose.msra.mxu0 %v84_v4  ;;  %v242_v57 = vld [vmem:[#allocation7 + $0x48] sm:$0xff]  ;;  %v243_v58 = vld [vmem:[#allocation7 + $0x50] sm:$0xff]  ;;  %v244_v59 = vld [vmem:[#allocation7 + $0x58] sm:$0xff] }
  0x34   :  { %500 = vmatprep.subr.mxu0 %v83_v5  ;;  %v245_v60 = vld [vmem:[#allocation7 + $0x60] sm:$0xff]  ;;  %v246_v61 = vld [vmem:[#allocation7 + $0x68] sm:$0xff]  ;;  %v247_v62 = vld [vmem:[#allocation7 + $0x70] sm:$0xff] }
  0x35   :  { %v248_v63 = vld [vmem:[#allocation7 + $0x78] sm:$0xff] }
  0x37   :  { %501 = vmatpush3.xpose.msra.mxu0 %v83_v5 }
  0x38   :  { %502 = vmatprep.subr.mxu0 %v82_v6 }
  0x3b   :  { %503 = vmatpush3.xpose.msra.mxu0 %v82_v6 }
  0x3c   :  { %504 = vmatprep.subr.mxu0 %v81_v7 }
  0x3f   :  { %505 = vmatpush3.xpose.msra.mxu0 %v81_v7 }
  0x40   :  { %506 = vmatprep.subr.mxu0 %v80_v8 }
  0x43   :  { %507 = vmatpush3.xpose.msra.mxu0 %v80_v8 }
  0x44   :  { %508 = vmatprep.subr.mxu0 %v79_v9 }
  0x47   :  { %509 = vmatpush3.xpose.msra.mxu0 %v79_v9 }
  0x48   :  { %510 = vmatprep.subr.mxu0 %v78_v10 }
  0x4b   :  { %511 = vmatpush3.xpose.msra.mxu0 %v78_v10 }
  0x4c   :  { %512 = vmatprep.subr.mxu0 %v77_v11 }
  0x4f   :  { %513 = vmatpush3.xpose.msra.mxu0 %v77_v11 }
  0x50   :  { %514 = vmatprep.subr.mxu0 %v76_v12 }
  0x53   :  { %515 = vmatpush3.xpose.msra.mxu0 %v76_v12 }
  0x54   :  { %516 = vmatprep.subr.mxu0 %v75_v13 }
  0x57   :  { %517 = vmatpush3.xpose.msra.mxu0 %v75_v13 }
  0x58   :  { %518 = vmatprep.subr.mxu0 %v74_v14 }
  0x5b   :  { %519 = vmatpush3.xpose.msra.mxu0 %v74_v14 }
  0x5c   :  { %520 = vmatprep.subr.mxu0 %v73_v15 }
  0x5f   :  { %521 = vmatpush3.xpose.msra.mxu0 %v73_v15 }
  0x60   :  { %522 = vmatprep.subr.mxu0 %v72_v16 }
  0x63   :  { %523 = vmatpush3.xpose.msra.mxu0 %v72_v16 }
  0x66   :  { %525 = vmatmul.mubr.f32.vlgmr.msra.gmra.mxu0 %v57_v17 }
  0x67   :  { %527 = vmatprep.mubr.f32.mxu0 %v58_v18 }
  0x6a   :  { %528 = vmatmul.mubr.f32.gmra.mxu0 %v59_v19 }
  0x6b   :  { %530 = vmatprep.mubr.f32.mxu0 %v60_v20 }
  0x6e   :  { %531 = vmatmul.mubr.f32.gmra.mxu0 %v61_v21 }
  0x6f   :  { %533 = vmatprep.mubr.f32.mxu0 %v62_v22 }
  0x72   :  { %534 = vmatmul.mubr.f32.gmra.mxu0 %v63_v23 }
  0x73   :  { %536 = vmatprep.mubr.f32.mxu0 %v64_v24 }
  0x76   :  { %537 = vmatmul.mubr.f32.gmra.mxu0 %v65_v25 }
  0x77   :  { %539 = vmatprep.mubr.f32.mxu0 %v66_v26 }
  0x7a   :  { %540 = vmatmul.mubr.f32.gmra.mxu0 %v67_v27 }
  0x7b   :  { %542 = vmatprep.mubr.f32.mxu0 %v68_v28 }
  0x7e   :  { %543 = vmatmul.mubr.f32.gmra.mxu0 %v69_v29 }
  0x7f   :  { %545 = vmatprep.mubr.f32.mxu0 %v70_v30 }
  0x82   :  { %546 = vmatmul.mubr.f32.gmra.mxu0 %v71_v31 }
 0x126   :  { %v526_v33 = vpop.f32.mrf.mxu0 }
 0x128   :  { %v154_v34 = vpop.f32.mrf.mxu0 }
 0x12a   :  { %v529_v35 = vpop.f32.mrf.mxu0 }
 0x12c   :  { %v164_v36 = vpop.f32.mrf.mxu0 }
 0x12e   :  { %v532_v37 = vpop.f32.mrf.mxu0 }
 0x130   :  { %v174_v38 = vpop.f32.mrf.mxu0 }
 0x132   :  { %v535_v39 = vpop.f32.mrf.mxu0 }
 0x134   :  { %v184_v40 = vpop.f32.mrf.mxu0 }
 0x136   :  { %v538_v41 = vpop.f32.mrf.mxu0 }
 0x138   :  { %v194_v42 = vpop.f32.mrf.mxu0 }
 0x13a   :  { %v541_v43 = vpop.f32.mrf.mxu0 }
 0x13c   :  { %v204_v44 = vpop.f32.mrf.mxu0 }
 0x13e   :  { %v544_v45 = vpop.f32.mrf.mxu0 }
 0x140   :  { %v214_v46 = vpop.f32.mrf.mxu0 }
 0x142   :  { %v547_v47 = vpop.f32.mrf.mxu0 }
 0x143   :  { %548 = vmatprep.subr.mxu1 %v547_v47 }
 0x144   :  { %v224_v48 = vpop.f32.mrf.mxu0  ;;  %549 = vmatpush3.msra.mxu1 %v547_v47 }
 0x145   :  { %550 = vmatprep.subr.mxu1 %v224_v48 }
 0x146   :  { %551 = vmatpush3.msra.mxu1 %v224_v48 }
 0x147   :  { %552 = vmatprep.subr.mxu1 %v544_v45 }
 0x148   :  { %553 = vmatpush3.msra.mxu1 %v544_v45 }
 0x149   :  { %554 = vmatprep.subr.mxu1 %v214_v46 }
 0x14a   :  { %555 = vmatpush3.msra.mxu1 %v214_v46 }
 0x14b   :  { %556 = vmatprep.subr.mxu1 %v541_v43 }
 0x14c   :  { %557 = vmatpush3.msra.mxu1 %v541_v43 }
 0x14d   :  { %558 = vmatprep.subr.mxu1 %v204_v44 }
 0x14e   :  { %559 = vmatpush3.msra.mxu1 %v204_v44 }
 0x14f   :  { %560 = vmatprep.subr.mxu1 %v538_v41 }
 0x150   :  { %561 = vmatpush3.msra.mxu1 %v538_v41 }
 0x151   :  { %562 = vmatprep.subr.mxu1 %v194_v42 }
 0x152   :  { %563 = vmatpush3.msra.mxu1 %v194_v42 }
 0x153   :  { %564 = vmatprep.subr.mxu1 %v535_v39 }
 0x154   :  { %565 = vmatpush3.msra.mxu1 %v535_v39 }
 0x155   :  { %566 = vmatprep.subr.mxu1 %v184_v40 }
 0x156   :  { %567 = vmatpush3.msra.mxu1 %v184_v40 }
 0x157   :  { %568 = vmatprep.subr.mxu1 %v532_v37 }
 0x158   :  { %569 = vmatpush3.msra.mxu1 %v532_v37 }
 0x159   :  { %570 = vmatprep.subr.mxu1 %v174_v38 }
 0x15a   :  { %571 = vmatpush3.msra.mxu1 %v174_v38 }
 0x15b   :  { %572 = vmatprep.subr.mxu1 %v529_v35 }
 0x15c   :  { %573 = vmatpush3.msra.mxu1 %v529_v35 }
 0x15d   :  { %574 = vmatprep.subr.mxu1 %v164_v36 }
 0x15e   :  { %575 = vmatpush3.msra.mxu1 %v164_v36 }
 0x15f   :  { %576 = vmatprep.subr.mxu1 %v526_v33 }
 0x160   :  { %577 = vmatpush3.msra.mxu1 %v526_v33 }
 0x161   :  { %578 = vmatprep.subr.mxu1 %v154_v34 }
 0x162   :  { %579 = vmatpush3.msra.mxu1 %v154_v34 }
 0x163   :  { %581 = vmatmul.mubr.f32.vlgmr.msra.gmra.mxu1 %v234_v49 }
 0x164   :  { %583 = vmatprep.mubr.f32.mxu1 %v235_v50 }
 0x167   :  { %584 = vmatmul.mubr.f32.gmra.mxu1 %v236_v51 }
 0x168   :  { %586 = vmatprep.mubr.f32.mxu1 %v237_v52 }
 0x16b   :  { %587 = vmatmul.mubr.f32.gmra.mxu1 %v238_v53 }
 0x16c   :  { %589 = vmatprep.mubr.f32.mxu1 %v239_v54 }
 0x16f   :  { %590 = vmatmul.mubr.f32.gmra.mxu1 %v240_v55 }
 0x170   :  { %592 = vmatprep.mubr.f32.mxu1 %v241_v56 }
 0x173   :  { %593 = vmatmul.mubr.f32.gmra.mxu1 %v242_v57 }
 0x174   :  { %595 = vmatprep.mubr.f32.mxu1 %v243_v58 }
 0x177   :  { %596 = vmatmul.mubr.f32.gmra.mxu1 %v244_v59 }
 0x178   :  { %598 = vmatprep.mubr.f32.mxu1 %v245_v60 }
 0x17b   :  { %599 = vmatmul.mubr.f32.gmra.mxu1 %v246_v61 }
 0x17c   :  { %601 = vmatprep.mubr.f32.mxu1 %v247_v62 }
 0x17f   :  { %602 = vmatmul.mubr.f32.gmra.mxu1 %v248_v63 }
 0x223   :  { %v582_v0 = vpop.f32.mrf.mxu1 }
 0x224   :  { %395 = vst [vmem:[#allocation8 + $0x8] sm:$0xff] %v582_v0 }
 0x225   :  { %v315_v1 = vpop.f32.mrf.mxu1 }
 0x226   :  { %394 = vst [vmem:[#allocation8] sm:$0xff] %v315_v1 }
 0x227   :  { %v585_v2 = vpop.f32.mrf.mxu1 }
 0x228   :  { %397 = vst [vmem:[#allocation8 + $0x18] sm:$0xff] %v585_v2 }
 0x229   :  { %v325_v3 = vpop.f32.mrf.mxu1 }
 0x22a   :  { %396 = vst [vmem:[#allocation8 + $0x10] sm:$0xff] %v325_v3 }
 0x22b   :  { %v588_v4 = vpop.f32.mrf.mxu1 }
 0x22c   :  { %399 = vst [vmem:[#allocation8 + $0x28] sm:$0xff] %v588_v4 }
 0x22d   :  { %v335_v5 = vpop.f32.mrf.mxu1 }
 0x22e   :  { %398 = vst [vmem:[#allocation8 + $0x20] sm:$0xff] %v335_v5 }
 0x22f   :  { %v591_v6 = vpop.f32.mrf.mxu1 }
 0x230   :  { %401 = vst [vmem:[#allocation8 + $0x38] sm:$0xff] %v591_v6 }
 0x231   :  { %v345_v7 = vpop.f32.mrf.mxu1 }
 0x232   :  { %400 = vst [vmem:[#allocation8 + $0x30] sm:$0xff] %v345_v7 }
 0x233   :  { %v594_v8 = vpop.f32.mrf.mxu1 }
 0x234   :  { %403 = vst [vmem:[#allocation8 + $0x48] sm:$0xff] %v594_v8 }
 0x235   :  { %v355_v9 = vpop.f32.mrf.mxu1 }
 0x236   :  { %402 = vst [vmem:[#allocation8 + $0x40] sm:$0xff] %v355_v9 }
 0x237   :  { %v597_v10 = vpop.f32.mrf.mxu1 }
 0x238   :  { %405 = vst [vmem:[#allocation8 + $0x58] sm:$0xff] %v597_v10 }
 0x239   :  { %v365_v11 = vpop.f32.mrf.mxu1 }
 0x23a   :  { %404 = vst [vmem:[#allocation8 + $0x50] sm:$0xff] %v365_v11 }
 0x23b   :  { %v600_v12 = vpop.f32.mrf.mxu1 }
 0x23c   :  { %407 = vst [vmem:[#allocation8 + $0x68] sm:$0xff] %v600_v12 }
 0x23d   :  { %v375_v13 = vpop.f32.mrf.mxu1 }
 0x23e   :  { %406 = vst [vmem:[#allocation8 + $0x60] sm:$0xff] %v375_v13 }
 0x23f   :  { %v603_v14 = vpop.f32.mrf.mxu1 }
 0x240   :  { %409 = vst [vmem:[#allocation8 + $0x78] sm:$0xff] %v603_v14 }
 0x241   :  { %v385_v15 = vpop.f32.mrf.mxu1 }
 0x242   :  { %408 = vst [vmem:[#allocation8 + $0x70] sm:$0xff] %v385_v15 }
 0x243   :  { %681 = shalt.err (!%p678_p5)
}
 0x244   :  { %421 = dma.vmem_to_hbm [thread:$0]  %s416_s2, 2048, %s749_s3, [#allocation4], %s698_s17, %s698_s17, %s699_s18  }
 0x245   :  { %694 = dma.done.wait [#allocation4], 2048  }
 0x246   :  { %695 = vsyncadd [#allocation4], 4294965248 }
 0x247   :  { %425 = vsyncpa [#allocation3], 1 }
 0x248   :  { %426 = vsyncpa [#allocation6], 1 }
 0x249   :  { %427 = vsyncpa [#allocation4], 1 }

</bundles_post_ra>
